<compile_context>
chip_gen: v5e
topology: v5e:2x2
jax: 0.10.0
libtpu: 0.0.40
codegen_flags: <defaults>
</compile_context>

<pallas_src>
import math

import jax
import jax.numpy as jnp
from jax.experimental import pallas as pl
from jax.experimental.pallas import tpu as pltpu


def _round_up(x, m):
    return ((x + m - 1) // m) * m


def _logreg_kernel(x_ref, w_ref, b_ref, o_ref):
    # MXU: bf16 x bf16 -> f32 accumulate.
    z = jnp.dot(x_ref[...], w_ref[...], preferred_element_type=jnp.float32)
    # Epilogue on the f32 accumulator (bias broadcast over batch rows).
    z = z + b_ref[...]
    e = jnp.exp(-z)                                   # EUP exp
    o_ref[...] = pl.reciprocal(1.0 + e, approx=True).astype(o_ref.dtype)  # EUP recip


def logistic_regression_forward(x, w, b, *, max_block_b=512,
                                vmem_budget_bytes=24 * 1024 * 1024):
    """x: [B, D_in] f32, w: [D_in, D_out] f32, b: [D_out] f32 -> [B, D_out] f32."""
    B, D_in = x.shape
    D_out = w.shape[1]

    # Lane-dense padding: last dims to multiples of 128.
    D_in_p = _round_up(D_in, 128)
    D_out_p = _round_up(D_out, 128)

    # Batch tile: as large as a conservative VMEM budget allows (double-buffered
    # x and o tiles plus the resident bf16 W slab), capped at max_block_b rows.
    # Budget is kept well under v7x's 32 MiB scoped VMEM.
    w_bytes = D_in_p * D_out_p * 2                       # resident bf16 weights
    per_row = 2 * (D_in_p * 2) + 2 * (D_out_p * 4)       # dbl-buffered x(bf16) + o(f32)
    tb = max(8, min(max_block_b, (vmem_budget_bytes - w_bytes) // max(per_row, 1)))
    tb = _round_up(min(tb, _round_up(B, 8)), 8)
    B_p = _round_up(B, tb)

    # Pad + cast matmul operands to bf16; bias stays f32.
    x_p = jnp.zeros((B_p, D_in_p), jnp.bfloat16).at[:B, :D_in].set(
        x.astype(jnp.bfloat16))
    w_p = jnp.zeros((D_in_p, D_out_p), jnp.bfloat16).at[:D_in, :D_out].set(
        w.astype(jnp.bfloat16))
    b_p = jnp.zeros((1, D_out_p), jnp.float32).at[0, :D_out].set(
        b.astype(jnp.float32))

    grid = (B_p // tb,)
    cost = pl.CostEstimate(
        flops=2 * B_p * D_in_p * D_out_p,
        transcendentals=B_p * D_out_p,
        bytes_accessed=2 * B_p * D_in_p + 2 * D_in_p * D_out_p + 4 * B_p * D_out_p,
    )

    out = pl.pallas_call(
        _logreg_kernel,
        out_shape=jax.ShapeDtypeStruct((B_p, D_out_p), jnp.float32),
        grid=grid,
        in_specs=[
            pl.BlockSpec((tb, D_in_p), lambda i: (i, 0)),        # batch-tiled x
            pl.BlockSpec((D_in_p, D_out_p), lambda i: (0, 0)),   # resident W
            pl.BlockSpec((1, D_out_p), lambda i: (0, 0)),        # resident bias
        ],
        out_specs=pl.BlockSpec((tb, D_out_p), lambda i: (i, 0)),
        compiler_params=pltpu.CompilerParams(
            dimension_semantics=("parallel",),
        ),
        cost_estimate=cost,
    )(x_p, w_p, b_p)

    # Slice padding back off.
    return out[:B, :D_out]


if __name__ == "__main__":
    # Small shapes consistent with the module: dim_in=32, dim_out=16, batch=8.
    B, D_in, D_out = 8, 32, 16

    key = jax.random.PRNGKey(0)
    kx, kw, kb = jax.random.split(key, 3)

    # Deterministic parameter init mimicking nn.Linear (uniform +/- 1/sqrt(dim_in)).
    bound = 1.0 / math.sqrt(D_in)
    # PyTorch stores weight as [D_out, D_in]; we keep the transposed [D_in, D_out] layout.
    w_pt = jax.random.uniform(kw, (D_out, D_in), jnp.float32, -bound, bound)
    w = w_pt.T
    b = jax.random.uniform(kb, (D_out,), jnp.float32, -bound, bound)

    x = jax.random.normal(kx, (B, D_in), jnp.float32)

    y = logistic_regression_forward(x, w, b)
    jax.block_until_ready(y)

    # Sanity check against plain-JAX f32 reference (tolerance relaxed for
    # bf16 matmul operands + approx reciprocal).
    y_ref = jax.nn.sigmoid(x @ w + b)
    assert y.shape == (B, D_out)
    assert jnp.allclose(y, y_ref, atol=2e-2, rtol=2e-2), float(
        jnp.max(jnp.abs(y - y_ref)))

    print("KERNEL_OK")
</pallas_src>

<mosaic_0001>
module attributes {stable_mosaic.version = 11 : i64} {
  func.func @_logreg_kernel(%arg0: i32, %arg1: memref<8x128xbf16, #tpu.memory_space<vmem>>, %arg2: memref<128x128xbf16, #tpu.memory_space<vmem>>, %arg3: memref<1x128xf32, #tpu.memory_space<vmem>>, %arg4: memref<8x128xf32, #tpu.memory_space<vmem>>) attributes {dimension_semantics = [#tpu.dimension_semantics<parallel>], iteration_bounds = array<i64: 1>, scalar_prefetch = 0 : i64, scratch_operands = 0 : i64, tpu.core_type = #tpu.core_type<tc>, window_params = [{transform_indices = @transform_0, window_bounds = array<i64: 8, 128>}, {pipeline_mode = #tpu.pipeline_mode<synchronous>, transform_indices = @transform_1, window_bounds = array<i64: 128, 128>}, {pipeline_mode = #tpu.pipeline_mode<synchronous>, transform_indices = @transform_2, window_bounds = array<i64: 1, 128>}, {transform_indices = @transform_3, window_bounds = array<i64: 8, 128>}]} {
    %c0 = arith.constant 0 : index
    %c0_0 = arith.constant 0 : index
    %0 = vector.load %arg1[%c0, %c0_0] : memref<8x128xbf16, #tpu.memory_space<vmem>>, vector<8x128xbf16>
    %c0_1 = arith.constant 0 : index
    %c0_2 = arith.constant 0 : index
    %1 = vector.load %arg2[%c0_1, %c0_2] : memref<128x128xbf16, #tpu.memory_space<vmem>>, vector<128x128xbf16>
    %cst = arith.constant dense<0.000000e+00> : vector<8x128xf32>
    %2 = tpu.matmul %0, %1, %cst {dimension_numbers = #tpu.dot_dimension_numbers<[1], [0], [0], [1], [0, 0, 1, 1], [], []>} : vector<8x128xbf16>, vector<128x128xbf16>, vector<8x128xf32> -> vector<8x128xf32>
    %c0_3 = arith.constant 0 : index
    %c0_4 = arith.constant 0 : index
    %3 = vector.load %arg3[%c0_3, %c0_4] : memref<1x128xf32, #tpu.memory_space<vmem>>, vector<1x128xf32>
    %4 = vector.broadcast %3 : vector<1x128xf32> to vector<8x128xf32>
    %5 = arith.addf %2, %4 : vector<8x128xf32>
    %cst_5 = arith.constant 0.000000e+00 : f32
    %6 = vector.broadcast %cst_5 : f32 to vector<8x128xf32>
    %7 = arith.subf %6, %5 : vector<8x128xf32>
    %8 = math.exp %7 : vector<8x128xf32>
    %cst_6 = arith.constant 1.000000e+00 : f32
    %9 = vector.broadcast %cst_6 : f32 to vector<8x128xf32>
    %10 = arith.addf %9, %8 : vector<8x128xf32>
    %11 = tpu.reciprocal %10 {approx = true} : vector<8x128xf32> -> vector<8x128xf32>
    %c0_7 = arith.constant 0 : index
    %c0_8 = arith.constant 0 : index
    %12 = vector.load %arg4[%c0_7, %c0_8] : memref<8x128xf32, #tpu.memory_space<vmem>>, vector<8x128xf32>
    tpu.vector_store %arg4[%c0_7, %c0_8], %11 {strides = array<i32>} : memref<8x128xf32, #tpu.memory_space<vmem>>, vector<8x128xf32>,
    return
  }
  func.func @transform_0(%arg0: i32) -> (i32, i32) {
    %c0_i32 = arith.constant 0 : i32
    %c0_i32_0 = arith.constant 0 : i32
    return %arg0, %c0_i32 : i32, i32
  }
  func.func @transform_1(%arg0: i32) -> (i32, i32) {
    %c0_i32 = arith.constant 0 : i32
    %c0_i32_0 = arith.constant 0 : i32
    %c0_i32_1 = arith.constant 0 : i32
    return %c0_i32, %c0_i32_0 : i32, i32
  }
  func.func @transform_2(%arg0: i32) -> (i32, i32) {
    %c0_i32 = arith.constant 0 : i32
    %c0_i32_0 = arith.constant 0 : i32
    %c0_i32_1 = arith.constant 0 : i32
    return %c0_i32, %c0_i32_0 : i32, i32
  }
  func.func @transform_3(%arg0: i32) -> (i32, i32) {
    %c0_i32 = arith.constant 0 : i32
    %c0_i32_0 = arith.constant 0 : i32
    return %arg0, %c0_i32 : i32, i32
  }
}

</mosaic_0001>

<bundles_post_ra>
// kernel: tpu_custom_call.1
= control target key start
LH: loop header
LB: loop body
LE: loop exit
PB: predicated region body
PF: predicated region fallthrough
CT: control target
= control target key end

     0   :  { %8 = vsyncpa [#allocation3], 0  ;;  %s316_s0 = inlined_call_operand.hbm [shape: bf16[8,128], index: 0, kind: input, shape index: {}]   ;;  %s317_s1 = inlined_call_operand.hbm [shape: bf16[128,128], index: 1, kind: input, shape index: {}]   ;;  %s318_s2 = inlined_call_operand.vmem [shape: f32[1,128], index: 2, kind: input, shape index: {}]   ;;  %s319_s3 = inlined_call_operand.hbm [shape: f32[8,128], index: 3, kind: output, shape index: {}]  }
   0x1   :  { %9 = vsyncpa [#allocation6], 0 }
   0x2   :  { %10 = vsyncpa [#allocation4], 0  ;;  %s16_s14 = sshll.u32 %s316_s0, 4  ;;  %s279_s15 = smov [#allocation2]   ;;  %s17_s14 = int_to_ptr.hbm [resolvable:$true] %s16_s14 }
   0x3   :  { %s18_s16 = sshll.u32 %s279_s15, 4  ;;  %s26_s19 = sshll.u32 %s317_s1, 4  ;;  %s19_s16 = int_to_ptr.vmem [resolvable:$true] %s18_s16  ;;  %s27_s19 = int_to_ptr.hbm [resolvable:$true] %s26_s19 }
   0x4   :  { %21 = dma.hbm_to_vmem [thread:$0]  %s17_s14, 64, %s19_s16, [#allocation3]  }
   0x5   :  { %s280_s20 = smov [#allocation5]   ;;  %s281_s22 = smov 64  }
   0x6   :  { %s28_s21 = sshll.u32 %s280_s20, 4  ;;  %s282_s23 = smov 4   ;;  %s29_s21 = int_to_ptr.vmem [resolvable:$true] %s28_s21 }
   0x7   :  { %34 = dma.hbm_to_vmem [thread:$0]  %s27_s19, 1024, %s29_s21, [#allocation6], %s281_s22, %s281_s22, %s282_s23  }
   0x8   :  { %273 = dma.done.wait [#allocation3], 64  }
   0x9   :  { %274 = vsyncadd [#allocation3], 4294967232 }
   0xa   :  { %275 = dma.done.wait [#allocation6], 1024  }
   0xb   :  { %276 = vsyncadd [#allocation6], 4294966272  ;;  %v190_v0 = vld [vmem:[#allocation5 + $0x38] sm:$0xff]  ;;  %v189_v1 = vld [vmem:[#allocation5 + $0x30] sm:$0xff]  ;;  %s283_s24 = smov [#allocation7]   ;;  %s140_s28 = sshll.u32 %s319_s3, 4  ;;  %s141_s28 = int_to_ptr.hbm [resolvable:$true] %s140_s28 }
   0xc   :  { %114 = vmatpush.bf16.msra.mxu0 %v190_v0  ;;  %v188_v2 = vld [vmem:[#allocation5 + $0x28] sm:$0xff]  ;;  %v187_v3 = vld [vmem:[#allocation5 + $0x20] sm:$0xff]  ;;  %v186_v4 = vld [vmem:[#allocation5 + $0x18] sm:$0xff]  ;;  %s138_s25 = sshll.u32 %s283_s24, 4  ;;  %s139_s25 = int_to_ptr.vmem [resolvable:$true] %s138_s25 }
   0xd   :  { %v185_v5 = vld [vmem:[#allocation5 + $0x10] sm:$0xff]  ;;  %v184_v6 = vld [vmem:[#allocation5 + $0x8] sm:$0xff]  ;;  %v183_v7 = vld [vmem:[#allocation5] sm:$0xff] }
   0xe   :  { %v45_v8 = vld [vmem:[#allocation2] sm:$0xf] }
   0xf   :  { %v196_v9 = vld [vmem:[%s318_s2] ss:$0 sm:$0xff] }
  0x10   :  { %115 = vmatpush.bf16.msra.mxu0 %v189_v1 }
  0x14   :  { %116 = vmatpush.bf16.msra.mxu0 %v188_v2 }
  0x18   :  { %117 = vmatpush.bf16.msra.mxu0 %v187_v3 }
  0x1c   :  { %118 = vmatpush.bf16.msra.mxu0 %v186_v4 }
  0x20   :  { %119 = vmatpush.bf16.msra.mxu0 %v185_v5 }
  0x24   :  { %120 = vmatpush.bf16.msra.mxu0 %v184_v6 }
  0x28   :  { %121 = vmatpush.bf16.msra.mxu0 %v183_v7 }
  0x2b   :  { %122 = vmatmul.bf16.vlgmr.msra.gmra.mxu0 %v45_v8 }
  0xa8   :  { %v123_v10 = vpop.f32.mrf.mxu0 }
  0xa9   :  { %v124_v11 = vadd.f32 %v196_v9, %v123_v10 }
  0xab   :  { %v127_v12 = vsub.f32 0.0, %v124_v11 }
  0xad   :  { %v128_v13 = vmul.f32 1.442695, %v127_v12 }
  0xaf   :  { %197 = vpow2.f32 %v128_v13 }
  0xb0   :  { %v125_v14 = vpop.f32.mrf.mxu0 }
  0xb5   :  { %v198_v15 = vpop.eup %197 }
  0xb6   :  { %v130_v16 = vadd.f32 1.0, %v198_v15 }
  0xb8   :  { %199 = vrcp.f32 %v130_v16 }
  0xbe   :  { %v200_v17 = vpop.eup %199 }
  0xbf   :  { %132 = vst [vmem:[#allocation7] sm:$0xff] %v200_v17 }
  0xc0   :  { %143 = dma.vmem_to_hbm [thread:$0]  %s139_s25, 128, %s141_s28, [#allocation4]  }
  0xc1   :  { %277 = dma.done.wait [#allocation4], 128  }
  0xc2   :  { %278 = vsyncadd [#allocation4], 4294967168 }
  0xc3   :  { %148 = vsyncpa [#allocation3], 1 }
  0xc4   :  { %149 = vsyncpa [#allocation6], 1 }
  0xc5   :  { %150 = vsyncpa [#allocation4], 1 }

</bundles_post_ra>
